<compile_context>
chip_gen: v7x
topology: tpu7x:2x2x1
jax: 0.10.0
libtpu: 0.0.40
codegen_flags: <defaults>
</compile_context>

<pallas_src>
import jax
import jax.numpy as jnp
from jax.experimental import pallas as pl
from jax.experimental.pallas import tpu as pltpu


def _round_up(a, b):
    return ((a + b - 1) // b) * b


def _outconv_kernel(x_ref, w_ref, b_ref, o_ref):
    # x_ref: (Bb, C_in, T)   w_ref: (C_out, C_in)   b_ref: (C_out, 1)
    # o_ref: (Bb, C_out, T)  -- T is the lane-dense spatial tile, Bb is the
    # (static) number of batch rows folded into this block (1 or N).
    w = w_ref[...]
    b = b_ref[...]
    for i in range(x_ref.shape[0]):  # tiny static unrolled loop (Bb is 1 or N)
        y = jnp.dot(w, x_ref[i],
                    preferred_element_type=jnp.float32,
                    precision=jax.lax.Precision.HIGHEST)
        o_ref[i] = (y + b).astype(o_ref.dtype)


def outconv_pallas(x_nchw, weight, bias, *, max_lane_tile=8192,
                   vmem_budget_bytes=12 * 1024 * 1024):
    """1x1 conv, NCHW in / NCHW out.

    x_nchw: (N, C_in, H, W). weight: (C_out, C_in, 1, 1). bias: (C_out,).
    """
    n, c_in, h, w = x_nchw.shape
    c_out = weight.shape[0]
    m = h * w

    # Free reshape (no data movement): NCHW -> (N, C_in, H*W).
    x3 = x_nchw.reshape(n, c_in, m)
    itemsize = x3.dtype.itemsize

    # VMEM cost per lane column per batch row: double-buffered input block +
    # double-buffered output block.
    bytes_per_lane = 2 * (c_in + c_out) * itemsize
    t_cap = (vmem_budget_bytes // bytes_per_lane) // 128 * 128
    t_cap = max(128, min(max_lane_tile, t_cap))

    # Balance the tiles so the single ragged last tile overshoots < 128 cols.
    n_tiles = pl.cdiv(m, t_cap)
    t_lanes = _round_up(pl.cdiv(m, n_tiles), 128)
    m_tiles = pl.cdiv(m, t_lanes)

    # v7x megacore: if the grid would be a single block but the spatial axis
    # is large enough, split it so both TensorCores get work.
    if n * m_tiles < 2 and m >= 256:
        t_lanes = _round_up(pl.cdiv(m, 2), 128)
        m_tiles = pl.cdiv(m, t_lanes)

    # Fold the whole batch into one block when it still fits the VMEM budget:
    # fewer grid steps -> less fixed per-step overhead (dominant at the real
    # cbdnet size of 2 x 64 x 10 x 10, which then runs in one step).
    b_block = n if n * bytes_per_lane * t_lanes <= vmem_budget_bytes else 1
    grid = (n // b_block, m_tiles)

    w_mat = weight.reshape(c_out, c_in)   # (C_out, C_in), VMEM-resident
    b_col = bias.reshape(c_out, 1)        # broadcasts along lanes in-kernel

    cost = pl.CostEstimate(
        flops=2 * n * m * c_in * c_out,
        transcendentals=0,
        bytes_accessed=(x3.size + w_mat.size + b_col.size + n * c_out * m)
        * itemsize,
    )

    out3 = pl.pallas_call(
        _outconv_kernel,
        out_shape=jax.ShapeDtypeStruct((n, c_out, m), x3.dtype),
        grid_spec=pltpu.PrefetchScalarGridSpec(
            num_scalar_prefetch=0,
            grid=grid,
            in_specs=[
                # x: (batch-block, channels, lane-tile); last tile is ragged.
                pl.BlockSpec((b_block, c_in, t_lanes), lambda i, j: (i, 0, j)),
                # W, b: tiny, same block every step (loaded once, resident).
                pl.BlockSpec((c_out, c_in), lambda i, j: (0, 0)),
                pl.BlockSpec((c_out, 1), lambda i, j: (0, 0)),
            ],
            out_specs=pl.BlockSpec((b_block, c_out, t_lanes),
                                   lambda i, j: (i, 0, j)),
        ),
        compiler_params=pltpu.CompilerParams(
            dimension_semantics=("parallel", "parallel"),
            vmem_limit_bytes=int(vmem_budget_bytes + (2 << 20)),
        ),
        cost_estimate=cost,
    )(x3, w_mat, b_col)

    return out3.reshape(n, c_out, h, w)


if __name__ == "__main__":
    key = jax.random.PRNGKey(0)
    k_x, k_w, k_b = jax.random.split(key, 3)

    # UNet.outc in cbdnet is outconv(64, 3); cbdnet reshapes its input to
    # (-1, 3, 10, 10), so the output head sees a 10x10 spatial grid.
    n, in_ch, out_ch, hw = 2, 64, 3, 10
    x = jax.random.normal(k_x, (n, in_ch, hw, hw), dtype=jnp.float32)

    # Deterministic synthetic Conv2d(in_ch, out_ch, 1) parameters.
    fan_in = in_ch  # 1x1 kernel
    bound = 1.0 / (fan_in ** 0.5)
    weight = jax.random.uniform(k_w, (out_ch, in_ch, 1, 1),
                                minval=-bound, maxval=bound, dtype=jnp.float32)
    bias = jax.random.uniform(k_b, (out_ch,),
                              minval=-bound, maxval=bound, dtype=jnp.float32)

    y = outconv_pallas(x, weight, bias)
    jax.block_until_ready(y)

    # Reference check against plain-JAX 1x1 conv at full precision (the kernel
    # also runs its dot at Precision.HIGHEST, so tolerances can be tight).
    y_ref = jnp.einsum("nchw,oc->nohw", x, weight.reshape(out_ch, in_ch),
                       precision=jax.lax.Precision.HIGHEST) \
            + bias.reshape(1, out_ch, 1, 1)
    assert y.shape == (n, out_ch, hw, hw)
    assert jnp.allclose(y, y_ref, atol=1e-4, rtol=1e-4), "mismatch vs reference"

    print("KERNEL_OK")
</pallas_src>

<mosaic_0001>
module attributes {stable_mosaic.version = 11 : i64} {
  func.func @_outconv_kernel(%arg0: i32, %arg1: i32, %arg2: memref<2x64x128xf32, #tpu.memory_space<vmem>>, %arg3: memref<3x64xf32, #tpu.memory_space<vmem>>, %arg4: memref<3x1xf32, #tpu.memory_space<vmem>>, %arg5: memref<2x3x128xf32, #tpu.memory_space<vmem>>) attributes {dimension_semantics = [#tpu.dimension_semantics<parallel>, #tpu.dimension_semantics<parallel>], iteration_bounds = array<i64: 1, 1>, scalar_prefetch = 0 : i64, scratch_operands = 0 : i64, tpu.core_type = #tpu.core_type<tc>, window_params = [{transform_indices = @transform_0, window_bounds = array<i64: 2, 64, 128>}, {pipeline_mode = #tpu.pipeline_mode<synchronous>, transform_indices = @transform_1, window_bounds = array<i64: 3, 64>}, {pipeline_mode = #tpu.pipeline_mode<synchronous>, transform_indices = @transform_2, window_bounds = array<i64: 3, 1>}, {transform_indices = @transform_3, window_bounds = array<i64: 2, 3, 128>}]} {
    %c0 = arith.constant 0 : index
    %c0_0 = arith.constant 0 : index
    %0 = vector.load %arg3[%c0, %c0_0] : memref<3x64xf32, #tpu.memory_space<vmem>>, vector<3x64xf32>
    %c0_1 = arith.constant 0 : index
    %c0_2 = arith.constant 0 : index
    %1 = vector.load %arg4[%c0_1, %c0_2] : memref<3x1xf32, #tpu.memory_space<vmem>>, vector<3x1xf32>
    %c0_3 = arith.constant 0 : index
    %c0_4 = arith.constant 0 : index
    %c0_5 = arith.constant 0 : index
    %2 = vector.load %arg2[%c0_3, %c0_4, %c0_5] : memref<2x64x128xf32, #tpu.memory_space<vmem>>, vector<1x64x128xf32>
    %3 = vector.shape_cast %2 : vector<1x64x128xf32> to vector<64x128xf32>
    %cst = arith.constant dense<0.000000e+00> : vector<3x128xf32>
    %4 = tpu.matmul %0, %3, %cst {dimension_numbers = #tpu.dot_dimension_numbers<[1], [0], [0], [1], [0, 0, 1, 1], [], []>, precision = #tpu.contract_precision<fp32>} : vector<3x64xf32>, vector<64x128xf32>, vector<3x128xf32> -> vector<3x128xf32>
    %5 = vector.broadcast %1 : vector<3x1xf32> to vector<3x128xf32>
    %6 = arith.addf %4, %5 : vector<3x128xf32>
    %c0_6 = arith.constant 0 : index
    %c0_7 = arith.constant 0 : index
    %c0_8 = arith.constant 0 : index
    %7 = vector.load %arg5[%c0_6, %c0_7, %c0_8] : memref<2x3x128xf32, #tpu.memory_space<vmem>>, vector<1x3x128xf32>
    %8 = vector.shape_cast %7 : vector<1x3x128xf32> to vector<3x128xf32>
    %9 = vector.shape_cast %6 : vector<3x128xf32> to vector<1x3x128xf32>
    tpu.vector_store %arg5[%c0_6, %c0_7, %c0_8], %9 {strides = array<i32>} : memref<2x3x128xf32, #tpu.memory_space<vmem>>, vector<1x3x128xf32>,
    %c1 = arith.constant 1 : index
    %c0_9 = arith.constant 0 : index
    %c0_10 = arith.constant 0 : index
    %10 = vector.load %arg2[%c1, %c0_9, %c0_10] : memref<2x64x128xf32, #tpu.memory_space<vmem>>, vector<1x64x128xf32>
    %11 = vector.shape_cast %10 : vector<1x64x128xf32> to vector<64x128xf32>
    %cst_11 = arith.constant dense<0.000000e+00> : vector<3x128xf32>
    %12 = tpu.matmul %0, %11, %cst_11 {dimension_numbers = #tpu.dot_dimension_numbers<[1], [0], [0], [1], [0, 0, 1, 1], [], []>, precision = #tpu.contract_precision<fp32>} : vector<3x64xf32>, vector<64x128xf32>, vector<3x128xf32> -> vector<3x128xf32>
    %13 = vector.broadcast %1 : vector<3x1xf32> to vector<3x128xf32>
    %14 = arith.addf %12, %13 : vector<3x128xf32>
    %c1_12 = arith.constant 1 : index
    %c0_13 = arith.constant 0 : index
    %c0_14 = arith.constant 0 : index
    %15 = vector.load %arg5[%c1_12, %c0_13, %c0_14] : memref<2x3x128xf32, #tpu.memory_space<vmem>>, vector<1x3x128xf32>
    %16 = vector.shape_cast %15 : vector<1x3x128xf32> to vector<3x128xf32>
    %17 = vector.shape_cast %14 : vector<3x128xf32> to vector<1x3x128xf32>
    tpu.vector_store %arg5[%c1_12, %c0_13, %c0_14], %17 {strides = array<i32>} : memref<2x3x128xf32, #tpu.memory_space<vmem>>, vector<1x3x128xf32>,
    return
  }
  func.func @transform_0(%arg0: i32, %arg1: i32) -> (i32, i32, i32) {
    %c0_i32 = arith.constant 0 : i32
    %c0_i32_0 = arith.constant 0 : i32
    return %arg0, %c0_i32, %arg1 : i32, i32, i32
  }
  func.func @transform_1(%arg0: i32, %arg1: i32) -> (i32, i32) {
    %c0_i32 = arith.constant 0 : i32
    %c0_i32_0 = arith.constant 0 : i32
    %c0_i32_1 = arith.constant 0 : i32
    return %c0_i32, %c0_i32_0 : i32, i32
  }
  func.func @transform_2(%arg0: i32, %arg1: i32) -> (i32, i32) {
    %c0_i32 = arith.constant 0 : i32
    %c0_i32_0 = arith.constant 0 : i32
    %c0_i32_1 = arith.constant 0 : i32
    return %c0_i32, %c0_i32_0 : i32, i32
  }
  func.func @transform_3(%arg0: i32, %arg1: i32) -> (i32, i32, i32) {
    %c0_i32 = arith.constant 0 : i32
    %c0_i32_0 = arith.constant 0 : i32
    return %arg0, %c0_i32, %arg1 : i32, i32, i32
  }
}

</mosaic_0001>

<bundles_post_ra>
// kernel: tpu_custom_call.1
= control target key start
LH: loop header
LB: loop body
LE: loop exit
PB: predicated region body
PF: predicated region fallthrough
CT: control target
= control target key end

     0   :  { %8 = vsyncpa [#allocation3], 0  ;;  %s1673_s12 = smov [#allocation2]   ;;  %s2001_s0 = inlined_call_operand.hbm [shape: f32[2,64,100], index: 0, kind: input, shape index: {}]   ;;  %s2002_s1 = inlined_call_operand.vmem [shape: f32[3,64], index: 1, kind: input, shape index: {}]   ;;  %s2003_s2 = inlined_call_operand.vmem [shape: f32[3,1], index: 2, kind: input, shape index: {}]   ;;  %s2004_s3 = inlined_call_operand.vmem [shape: f32[2,3,100], index: 3, kind: output, shape index: {}]  }
   0x1   :  { %s14_s13 = sshll.u32 %s1673_s12, 4  ;;  %s1649_s16 = scalar_lea.hbm %s2001_s0, 2048  ;;  %s15_s13 = int_to_ptr.vmem [resolvable:$true] %s14_s13 }
   0x2   :  { %p1650_p0 = scmp.ne.s32.totalorder %s2001_s0, %s1649_s16  ;;  %p1653_p1 = scmp.lt.u32.totalorder %s1649_s16, %s2001_s0 }
   0x4   :  { %p1655_p2 = pnand %p1653_p1, %p1650_p0 }
   0x6   :  { %1658 = shalt.err (!%p1655_p2)
}
   0x7   :  { %s1659_s21 = scalar_lea.vmem %s15_s13, 2048  ;;  %p1664_p4 = scmp.lt.s32.totalorder %s15_s13, %s15_s13 }
   0x8   :  { %p1660_p3 = scmp.ne.s32.totalorder %s15_s13, %s1659_s21  ;;  %p1665_p5 = scmp.lt.s32.totalorder %s1659_s21, %s1659_s21 }
   0xa   :  { %p1666_p6 = por %p1665_p5, %p1664_p4 }
   0xc   :  { %p1667_p7 = pnand %p1666_p6, %p1660_p3 }
   0xe   :  { %1670 = shalt.err (!%p1667_p7)
}
   0xf   :  { %s1674_s22 = smov 128   ;;  %s1675_s23 = smov 8  }
  0x10   :  { %20 = dma.hbm_to_vmem [thread:$0]  %s2001_s0, 2048, %s15_s13, [#allocation3], %s1674_s22, %s1674_s22, %s1675_s23  }
  0x11   :  { %1671 = dma.done.wait [#allocation3], 2048  }
  0x12   :  { %1672 = vsyncadd [#allocation3], 4294965248  ;;  %v1676_v0 = vmov 0.0|0.0   ;;  %vm1677_vm0 = vmmov 0   ;;  %v1678_v1 = vmov 0.0   ;;  %v1679_v2 = vmov 0  }
  0x13   :  { %1475 = vmatprep.subr.bf16.mxu0 %v1676_v0  ;;  %1547 = vmatprep.subr.bf16.mxu1 %v1676_v0  ;;  %v30_v3 = vld [vmem:[#allocation2] sm:$0xff]  ;;  %v31_v4 = vld [vmem:[#allocation2 + $0x8] sm:$0xff]  ;;  %vm43_vm1 = vcmask 523264   ;;  %v32_v10 = vld [vmem:[#allocation2 + $0x10] sm:$0xff] }
  0x14   :  { %1263 = vmatprep.mubr.msk.f32.mxu0 %vm1677_vm0, %v1678_v1  ;;  %1377 = vmatprep.mubr.msk.f32.mxu1 %vm1677_vm0, %v1678_v1  ;;  %v586_v5 = vld [vmem:[#allocation2 + $0x40] sm:$0xff]  ;;  %v48_v6 = vand.u32 4294901760, %v30_v3  ;;  %v51_v7 = vand.u32 4294901760, %v31_v4  ;;  %v587_v8 = vld [vmem:[#allocation2 + $0x48] sm:$0xff]  ;;  %v33_v11 = vld [vmem:[#allocation2 + $0x18] sm:$0xff]  ;;  %v54_v13 = vand.u32 4294901760, %v32_v10 }
  0x15   :  { %1648 = vset.pattern.permute.xlu0 %v1679_v2  ;;  %v595_v9 = vand.u32 4294901760, %v586_v5  ;;  %v598_v12 = vand.u32 4294901760, %v587_v8  ;;  %v57_v14 = vand.u32 4294901760, %v33_v11  ;;  %v588_v15 = vld [vmem:[#allocation2 + $0x50] sm:$0xff]  ;;  %v589_v16 = vld [vmem:[#allocation2 + $0x58] sm:$0xff]  ;;  %v34_v17 = vld [vmem:[#allocation2 + $0x20] sm:$0xff] }
  0x16   :  { %v1718_v18 = vpack.c.bf16 %v51_v7, %v48_v6  ;;  %v1720_v19 = vsub.f32 %v30_v3, %v48_v6  ;;  %v1722_v20 = vsub.f32 %v31_v4, %v51_v7  ;;  %v35_v22 = vld [vmem:[#allocation2 + $0x28] sm:$0xff]  ;;  %v590_v23 = vld [vmem:[#allocation2 + $0x60] sm:$0xff]  ;;  %v1732_v28 = vsub.f32 %v32_v10, %v54_v13  ;;  %v36_v29 = vld [vmem:[#allocation2 + $0x30] sm:$0xff] }
  0x17   :  { %v1724_v21 = vsub.f32 %v586_v5, %v595_v9  ;;  %v591_v24 = vld [vmem:[#allocation2 + $0x68] sm:$0xff]  ;;  %v1726_v25 = vpack.c.bf16 %v598_v12, %v595_v9  ;;  %v1728_v26 = vsub.f32 %v587_v8, %v598_v12  ;;  %v1730_v27 = vpack.c.bf16 %v57_v14, %v54_v13  ;;  %v37_v34 = vld [vmem:[#allocation2 + $0x38] sm:$0xff]  ;;  %v592_v35 = vld [vmem:[#allocation2 + $0x70] sm:$0xff] }
  0x18   :  { %1477 = vmatpush3.bf16.msra.mxu0 %v1718_v18  ;;  %v1735_v30 = vsub.f32 %v33_v11, %v57_v14  ;;  %v601_v31 = vand.u32 4294901760, %v588_v15  ;;  %v604_v32 = vand.u32 4294901760, %v589_v16  ;;  %v60_v33 = vand.u32 4294901760, %v34_v17  ;;  %v29_v40 = vld [vmem:[%s2003_s2] sm:$0x7]  ;;  %v593_v45 = vld [vmem:[#allocation2 + $0x78] sm:$0xff] }
  0x19   :  { %1549 = vmatpush3.bf16.msra.mxu1 %v1726_v25  ;;  %1478 = vmatprep.subr.bf16.mxu0 %v1676_v0  ;;  %v63_v36 = vand.u32 4294901760, %v35_v22  ;;  %v607_v37 = vand.u32 4294901760, %v590_v23  ;;  %v610_v38 = vand.u32 4294901760, %v591_v24  ;;  %v66_v39 = vand.u32 4294901760, %v36_v29  ;;  %v28_v46 = vld [vmem:[%s2002_s1] sm:$0x7] }
  0x1a   :  { %1550 = vmatprep.subr.bf16.mxu1 %v1676_v0  ;;  %v1743_v41 = vpack.c.bf16 %v604_v32, %v601_v31  ;;  %v1745_v42 = vsub.f32 %v588_v15, %v601_v31  ;;  %v1747_v43 = vsub.f32 %v589_v16, %v604_v32  ;;  %v1749_v44 = vsub.f32 %v34_v17, %v60_v33 }
  0x1b   :  { %v1754_v47 = vpack.c.bf16 %v63_v36, %v60_v33  ;;  %v1756_v48 = vsub.f32 %v35_v22, %v63_v36  ;;  %v1758_v49 = vpack.c.bf16 %v610_v38, %v607_v37  ;;  %v1760_v50 = vsub.f32 %v590_v23, %v607_v37  ;;  %40 = vperm.xlu0 %1648, %v29_v40  }
  0x1c   :  { %1480 = vmatpush3.bf16.msra.mxu0 %v1730_v27  ;;  %v1763_v51 = vsub.f32 %v591_v24, %v610_v38  ;;  %v69_v52 = vand.u32 4294901760, %v37_v34  ;;  %v1765_v53 = vsub.f32 %v36_v29, %v66_v39  ;;  %v613_v54 = vand.u32 4294901760, %v592_v35 }
  0x1d   :  { %1552 = vmatpush3.bf16.msra.mxu1 %v1743_v41  ;;  %1481 = vmatprep.subr.bf16.mxu0 %v1676_v0  ;;  %v616_v55 = vand.u32 4294901760, %v593_v45  ;;  %v45_v56 = vsel %vm43_vm1, %v28_v46, 0  ;;  %v133_v57 = vand.u32 4294901760, %v1720_v19  ;;  %v140_v58 = vand.u32 4294901760, %v1722_v20 }
  0x1e   :  { %1553 = vmatprep.subr.bf16.mxu1 %v1676_v0  ;;  %v1773_v59 = vpack.c.bf16 %v69_v52, %v66_v39  ;;  %v1775_v60 = vsub.f32 %v37_v34, %v69_v52  ;;  %v1777_v61 = vsub.f32 %v592_v35, %v613_v54  ;;  %v1779_v62 = vand.u32 4294901760, %v45_v56 }
  0x1f   :  { %v1781_v63 = vpack.c.bf16 %v616_v55, %v613_v54  ;;  %v1783_v2 = vsub.f32 %v593_v45, %v616_v55  ;;  %v134_v3 = vsub.f32 %v1720_v19, %v133_v57  ;;  %v141_v4 = vsub.f32 %v1722_v20, %v140_v58 }
  0x20   :  { %1483 = vmatpush3.bf16.msra.mxu0 %v1754_v47  ;;  %v1793_v5 = vsub.f32 %v45_v56, %v1779_v62  ;;  %v680_v6 = vand.u32 4294901760, %v1724_v21  ;;  %v687_v7 = vand.u32 4294901760, %v1728_v26  ;;  %v147_v8 = vand.u32 4294901760, %v1732_v28 }
  0x21   :  { %1555 = vmatpush3.bf16.msra.mxu1 %v1758_v49  ;;  %1484 = vmatprep.subr.bf16.mxu0 %v1676_v0  ;;  %v135_v9 = vand.u32 4294901760, %v134_v3  ;;  %v142_v10 = vand.u32 4294901760, %v141_v4  ;;  %v154_v11 = vand.u32 4294901760, %v1735_v30  ;;  %v694_v12 = vand.u32 4294901760, %v1745_v42 }
  0x22   :  { %1556 = vmatprep.subr.bf16.mxu1 %v1676_v0  ;;  %v1804_v13 = vand.u32 4294901760, %v1793_v5  ;;  %v681_v14 = vsub.f32 %v1724_v21, %v680_v6  ;;  %v688_v15 = vsub.f32 %v1728_v26, %v687_v7  ;;  %v148_v16 = vsub.f32 %v1732_v28, %v147_v8 }
  0x23   :  { %v1488_v17 = vpack.c.bf16 %v142_v10, %v135_v9  ;;  %v155_v22 = vsub.f32 %v1735_v30, %v154_v11  ;;  %v695_v23 = vsub.f32 %v1745_v42, %v694_v12  ;;  %v701_v24 = vand.u32 4294901760, %v1747_v43 }
  0x24   :  { %1486 = vmatpush3.bf16.msra.mxu0 %v1773_v59  ;;  %v123_v29 = vsub.f32 %v1793_v5, %v1804_v13  ;;  %v682_v31 = vand.u32 4294901760, %v681_v14  ;;  %v689_v32 = vand.u32 4294901760, %v688_v15  ;;  %v149_v33 = vand.u32 4294901760, %v148_v16 }
  0x25   :  { %1558 = vmatpush3.bf16.msra.mxu1 %v1781_v63  ;;  %1487 = vmatprep.subr.bf16.mxu0 %v1676_v0  ;;  %v156_v34 = vand.u32 4294901760, %v155_v22  ;;  %v696_v35 = vand.u32 4294901760, %v695_v23  ;;  %v702_v36 = vsub.f32 %v1747_v43, %v701_v24  ;;  %v161_v37 = vand.u32 4294901760, %v1749_v44 }
  0x26   :  { %1559 = vmatprep.subr.bf16.mxu1 %v1676_v0  ;;  %v124_v38 = vand.u32 4294901760, %v123_v29  ;;  %v1560_v39 = vpack.c.bf16 %v689_v32, %v682_v31  ;;  %v168_v40 = vand.u32 4294901760, %v1756_v48  ;;  %v708_v45 = vand.u32 4294901760, %v1760_v50 }
  0x27   :  { %v1491_v46 = vpack.c.bf16 %v156_v34, %v149_v33  ;;  %v703_v52 = vand.u32 4294901760, %v702_v36  ;;  %v162_v54 = vsub.f32 %v1749_v44, %v161_v37  ;;  %v715_v55 = vand.u32 4294901760, %v1763_v51 }
  0x28   :  { %1264 = vmatmul.mubr.f32.vlgmr.msra.gmra.mrb[0].mxu0 %v124_v38  ;;  %1378 = vmatmul.mubr.f32.vlgmr.msra.gmra.mrb[0].mxu1 %v124_v38  ;;  %v169_v56 = vsub.f32 %v1756_v48, %v168_v40  ;;  %v709_v3 = vsub.f32 %v1760_v50, %v708_v45  ;;  %v175_v4 = vand.u32 4294901760, %v1765_v53  ;;  %v182_v9 = vand.u32 4294901760, %v1775_v60 }
  0x29   :  { %1489 = vmatpush3.bf16.msra.mxu0 %v1488_v17  ;;  %1561 = vmatpush3.bf16.msra.mxu1 %v1560_v39  ;;  %v1563_v10 = vpack.c.bf16 %v703_v52, %v696_v35  ;;  %v163_v14 = vand.u32 4294901760, %v162_v54  ;;  %v716_v15 = vsub.f32 %v1763_v51, %v715_v55  ;;  %v722_v16 = vand.u32 4294901760, %v1777_v61 }
  0x2a   :  { %1490 = vmatprep.subr.bf16.mxu0 %v1676_v0  ;;  %1562 = vmatprep.subr.bf16.mxu1 %v1676_v0  ;;  %v170_v22 = vand.u32 4294901760, %v169_v56  ;;  %v710_v23 = vand.u32 4294901760, %v709_v3  ;;  %v176_v29 = vsub.f32 %v1765_v53, %v175_v4  ;;  %v183_v17 = vsub.f32 %v1775_v60, %v182_v9 }
  0x2b   :  { %v717_v31 = vand.u32 4294901760, %v716_v15  ;;  %v723_v32 = vsub.f32 %v1777_v61, %v722_v16  ;;  %v729_v33 = vand.u32 4294901760, %v1783_v2  ;;  %1282 = vmatprep.mubr.msk.f32.mxu0 %vm1677_vm0, %v1678_v1  ;;  %1396 = vmatprep.mubr.msk.f32.mxu1 %vm1677_vm0, %v1678_v1  ;;  %v1575_v15 = vpack.c.bf16 %v1747_v43, %v1745_v42 }
  0x2c   :  { %v1494_v34 = vpack.c.bf16 %v170_v22, %v163_v14  ;;  %v177_v35 = vand.u32 4294901760, %v176_v29  ;;  %v184_v38 = vand.u32 4294901760, %v183_v17  ;;  %v1503_v14 = vpack.c.bf16 %v1735_v30, %v1732_v28 }
  0x2d   :  { %1492 = vmatpush3.bf16.msra.mxu0 %v1491_v46  ;;  %1564 = vmatpush3.bf16.msra.mxu1 %v1563_v10  ;;  %v1566_v36 = vpack.c.bf16 %v717_v31, %v710_v23  ;;  %v724_v39 = vand.u32 4294901760, %v723_v32  ;;  %v730_v52 = vsub.f32 %v1783_v2, %v729_v33  ;;  %v1500_v46 = vpack.c.bf16 %v1722_v20, %v1720_v19 }
  0x2e   :  { %1493 = vmatprep.subr.bf16.mxu0 %v1676_v0  ;;  %1565 = vmatprep.subr.bf16.mxu1 %v1676_v0  ;;  %v1497_v56 = vpack.c.bf16 %v184_v38, %v177_v35  ;;  %v1572_v10 = vpack.c.bf16 %v1728_v26, %v1724_v21  ;;  %v1506_v22 = vpack.c.bf16 %v1756_v48, %v1749_v44 }
  0x2f   :  { %v731_v54 = vand.u32 4294901760, %v730_v52  ;;  %v1578_v23 = vpack.c.bf16 %v1763_v51, %v1760_v50  ;;  %v1509_v29 = vpack.c.bf16 %v1775_v60, %v1765_v53  ;;  %v1581_v17 = vpack.c.bf16 %v1783_v2, %v1777_v61 }
  0x30   :  { %v1596_v31 = vpack.c.bf16 %v687_v7, %v680_v6  ;;  %v1527_v19 = vpack.c.bf16 %v154_v11, %v147_v8  ;;  %v1599_v20 = vpack.c.bf16 %v701_v24, %v694_v12  ;;  %v1530_v21 = vpack.c.bf16 %v168_v40, %v161_v37 }
  0x31   :  { %1495 = vmatpush3.bf16.msra.mxu0 %v1494_v34  ;;  %1567 = vmatpush3.bf16.msra.mxu1 %v1566_v36  ;;  %v1569_v3 = vpack.c.bf16 %v731_v54, %v724_v39  ;;  %v1602_v26 = vpack.c.bf16 %v715_v55, %v708_v45  ;;  %v1533_v28 = vpack.c.bf16 %v182_v9, %v175_v4 }
  0x32   :  { %1496 = vmatprep.subr.bf16.mxu0 %v1676_v0  ;;  %1568 = vmatprep.subr.bf16.mxu1 %v1676_v0  ;;  %v1605_v30 = vpack.c.bf16 %v729_v33, %v722_v16 }
  0x35   :  { %1498 = vmatpush3.bf16.msra.mxu0 %v1497_v56  ;;  %1570 = vmatpush3.bf16.msra.mxu1 %v1569_v3 }
  0x36   :  { %1499 = vmatprep.subr.bf16.mxu0 %v1676_v0  ;;  %1571 = vmatprep.subr.bf16.mxu1 %v1676_v0 }
  0x38   :  { %1283 = vmatmul.mubr.f32.vlgmr.msra.gmra.mrb[0].mxu0 %v1779_v62  ;;  %1397 = vmatmul.mubr.f32.vlgmr.msra.gmra.mrb[0].mxu1 %v1779_v62 }
  0x39   :  { %1501 = vmatpush3.bf16.msra.mxu0 %v1500_v46  ;;  %1573 = vmatpush3.bf16.msra.mxu1 %v1572_v10 }
  0x3a   :  { %1502 = vmatprep.subr.bf16.mxu0 %v1676_v0  ;;  %1574 = vmatprep.subr.bf16.mxu1 %v1676_v0 }
  0x3b   :  { %1301 = vmatprep.mubr.msk.f32.mxu0 %vm1677_vm0, %v1678_v1  ;;  %1415 = vmatprep.mubr.msk.f32.mxu1 %vm1677_vm0, %v1678_v1 }
  0x3d   :  { %1504 = vmatpush3.bf16.msra.mxu0 %v1503_v14  ;;  %1576 = vmatpush3.bf16.msra.mxu1 %v1575_v15 }
  0x3e   :  { %1505 = vmatprep.subr.bf16.mxu0 %v1676_v0  ;;  %1577 = vmatprep.subr.bf16.mxu1 %v1676_v0 }
  0x41   :  { %1507 = vmatpush3.bf16.msra.mxu0 %v1506_v22  ;;  %1579 = vmatpush3.bf16.msra.mxu1 %v1578_v23 }
  0x42   :  { %1508 = vmatprep.subr.bf16.mxu0 %v1676_v0  ;;  %1580 = vmatprep.subr.bf16.mxu1 %v1676_v0 }
  0x45   :  { %1510 = vmatpush3.bf16.msra.mxu0 %v1509_v29  ;;  %1582 = vmatpush3.bf16.msra.mxu1 %v1581_v17 }
  0x46   :  { %1511 = vmatprep.subr.bf16.mxu0 %v1676_v0  ;;  %1583 = vmatprep.subr.bf16.mxu1 %v1676_v0 }
  0x48   :  { %1302 = vmatmul.mubr.f32.vlgmr.msra.gmra.mrb[0].mxu0 %v1793_v5  ;;  %1416 = vmatmul.mubr.f32.vlgmr.msra.gmra.mrb[0].mxu1 %v1793_v5  ;;  %v1524_v5 = vpack.c.bf16 %v140_v58, %v133_v57 }
  0x49   :  { %1513 = vmatpush3.bf16.msra.mxu0 %v1718_v18  ;;  %1585 = vmatpush3.bf16.msra.mxu1 %v1726_v25 }
  0x4a   :  { %1514 = vmatprep.subr.bf16.mxu0 %v1676_v0  ;;  %1586 = vmatprep.subr.bf16.mxu1 %v1676_v0 }
  0x4b   :  { %1320 = vmatprep.mubr.msk.f32.mxu0 %vm1677_vm0, %v1678_v1  ;;  %1434 = vmatprep.mubr.msk.f32.mxu1 %vm1677_vm0, %v1678_v1 }
  0x4d   :  { %1516 = vmatpush3.bf16.msra.mxu0 %v1730_v27  ;;  %1588 = vmatpush3.bf16.msra.mxu1 %v1743_v41 }
  0x4e   :  { %1517 = vmatprep.subr.bf16.mxu0 %v1676_v0  ;;  %1589 = vmatprep.subr.bf16.mxu1 %v1676_v0 }
  0x51   :  { %1519 = vmatpush3.bf16.msra.mxu0 %v1754_v47  ;;  %1591 = vmatpush3.bf16.msra.mxu1 %v1758_v49 }
  0x52   :  { %1520 = vmatprep.subr.bf16.mxu0 %v1676_v0  ;;  %1592 = vmatprep.subr.bf16.mxu1 %v1676_v0 }
  0x55   :  { %1522 = vmatpush3.bf16.msra.mxu0 %v1773_v59  ;;  %1594 = vmatpush3.bf16.msra.mxu1 %v1781_v63 }
  0x56   :  { %1523 = vmatprep.subr.bf16.mxu0 %v1676_v0  ;;  %1595 = vmatprep.subr.bf16.mxu1 %v1676_v0 }
  0x58   :  { %1321 = vmatmul.mubr.f32.vlgmr.msra.gmra.mrb[0].mxu0 %v1804_v13  ;;  %1435 = vmatmul.mubr.f32.vlgmr.msra.gmra.mrb[0].mxu1 %v1804_v13 }
  0x59   :  { %1525 = vmatpush3.bf16.msra.mxu0 %v1524_v5  ;;  %1597 = vmatpush3.bf16.msra.mxu1 %v1596_v31 }
  0x5a   :  { %1526 = vmatprep.subr.bf16.mxu0 %v1676_v0  ;;  %1598 = vmatprep.subr.bf16.mxu1 %v1676_v0 }
  0x5b   :  { %1339 = vmatprep.mubr.msk.f32.mxu0 %vm1677_vm0, %v1678_v1  ;;  %1453 = vmatprep.mubr.msk.f32.mxu1 %vm1677_vm0, %v1678_v1 }
  0x5d   :  { %1528 = vmatpush3.bf16.msra.mxu0 %v1527_v19  ;;  %1600 = vmatpush3.bf16.msra.mxu1 %v1599_v20 }
  0x5e   :  { %1529 = vmatprep.subr.bf16.mxu0 %v1676_v0  ;;  %1601 = vmatprep.subr.bf16.mxu1 %v1676_v0 }
  0x61   :  { %1531 = vmatpush3.bf16.msra.mxu0 %v1530_v21  ;;  %1603 = vmatpush3.bf16.msra.mxu1 %v1602_v26 }
  0x62   :  { %1532 = vmatprep.subr.bf16.mxu0 %v1676_v0  ;;  %1604 = vmatprep.subr.bf16.mxu1 %v1676_v0 }
  0x65   :  { %1534 = vmatpush3.bf16.msra.mxu0 %v1533_v28  ;;  %1606 = vmatpush3.bf16.msra.mxu1 %v1605_v30 }
  0x66   :  { %1535 = vmatprep.subr.bf16.mxu0 %v1676_v0  ;;  %1607 = vmatprep.subr.bf16.mxu1 %v1676_v0 }
  0x68   :  { %1340 = vmatmul.mubr.f32.vlgmr.msra.gmra.mrb[0].mxu0 %v1779_v62  ;;  %1454 = vmatmul.mubr.f32.vlgmr.msra.gmra.mrb[0].mxu1 %v1779_v62 }
  0x69   :  { %1537 = vmatpush3.bf16.msra.mxu0 %v1718_v18  ;;  %1609 = vmatpush3.bf16.msra.mxu1 %v1726_v25 }
  0x6a   :  { %1538 = vmatprep.subr.bf16.mxu0 %v1676_v0  ;;  %1610 = vmatprep.subr.bf16.mxu1 %v1676_v0 }
  0x6b   :  { %1358 = vmatprep.mubr.msk.f32.mxu0 %vm1677_vm0, %v1678_v1  ;;  %1472 = vmatprep.mubr.msk.f32.mxu1 %vm1677_vm0, %v1678_v1 }
  0x6d   :  { %1540 = vmatpush3.bf16.msra.mxu0 %v1730_v27  ;;  %1612 = vmatpush3.bf16.msra.mxu1 %v1743_v41 }
  0x6e   :  { %1541 = vmatprep.subr.bf16.mxu0 %v1676_v0  ;;  %1613 = vmatprep.subr.bf16.mxu1 %v1676_v0 }
  0x71   :  { %1543 = vmatpush3.bf16.msra.mxu0 %v1754_v47  ;;  %1615 = vmatpush3.bf16.msra.mxu1 %v1758_v49 }
  0x72   :  { %1544 = vmatprep.subr.bf16.mxu0 %v1676_v0  ;;  %1616 = vmatprep.subr.bf16.mxu1 %v1676_v0 }
  0x75   :  { %1546 = vmatpush3.bf16.msra.mxu0 %v1773_v59  ;;  %1618 = vmatpush3.bf16.msra.mxu1 %v1781_v63 }
  0x78   :  { %1359 = vmatmul.mubr.f32.vlgmr.msra.gmra.mrb[0].mxu0 %v1779_v62  ;;  %1473 = vmatmul.mubr.f32.vlgmr.msra.gmra.mrb[0].mxu1 %v1779_v62 }
  0x9a   :  { %v41_v1 = vpop.permute.xlu0 %40 }
 0x14b   :  { %v580_v18 = vpop.f32.mrb[0].mxu0  ;;  %v1127_v25 = vpop.f32.mrb[0].mxu1 }
 0x14c   :  { %v1619_v27 = vadd.f32 %v580_v18, %v41_v1  ;;  %v1620_v41 = vadd.f32 %v1127_v25, %v41_v1  ;;  %v1360_v42 = vpop.f32.mrb[1].mxu0  ;;  %v1474_v43 = vpop.f32.mrb[1].mxu1 }
 0x14e   :  { %584 = vst [vmem:[%s2004_s3] sm:$0x7] %v1619_v27  ;;  %1138 = vst [vmem:[%s2004_s3 + $0x4] sm:$0x7] %v1620_v41 }
 0x14f   :  { %1137 = vsyncpa [#allocation3], 1 }

</bundles_post_ra>
